<compile_context>
chip_gen: v7x
topology: tpu7x:2x2x1
jax: 0.10.0
libtpu: 0.0.40
codegen_flags: <defaults>
</compile_context>

<pallas_src>
import functools
import math

import jax
import jax.numpy as jnp
from jax.experimental import pallas as pl
from jax.experimental.pallas import tpu as pltpu

HIDDENS = (128, 256, 512, 256, 128)
LANE = 128
NEG = -1e30     # logit mask for padded action lanes (logits stay f32, so no -inf/NaN risk)


def _round_up(x, m):
    return ((x + m - 1) // m) * m


def _device_kind():
    try:
        return jax.devices()[0].device_kind.lower()
    except Exception:
        return ""


def _pick_tm(batch):
    """Batch-tile height: 8-row granularity for tiny batches (no padding), 128 on
    v5e, 256 on v6e/v7x once the batch is big enough to fill the 256x256 MXU and
    (on v7x) still leave >= 2 grid steps for the two TensorCores."""
    if batch <= 128:
        return _round_up(max(batch, 8), 8)
    kind = _device_kind()
    if "v5" in kind:
        return 128
    two_tc = "7" in kind          # v7x: 2 TCs per chip share the ("parallel",) grid
    return 256 if batch >= (512 if two_tc else 256) else 128


def actor_mlp_kernel(*refs, layers, n_w):
    """refs = (x_ref, w_buf_refs..., b_ref, out_ref).
    x_ref: (TM, F) f32 activations; w_buf_refs: dense bf16 weight buffers grouped by
    lane width; b_ref: (8, max_width) f32 biases (one per row); out_ref: (TM, 128)
    f32 softmax probabilities."""
    x_ref = refs[0]
    w_refs = refs[1:1 + n_w]
    b_ref = refs[1 + n_w]
    out_ref = refs[2 + n_w]

    h = x_ref[...].astype(jnp.bfloat16)                      # bf16 MXU operands
    n_layers = len(layers)
    for i, (buf, off, din, dout) in enumerate(layers):
        w = w_refs[buf][off:off + din, :]                    # bf16 (din, dout), static, dense lanes
        b = b_ref[i:i + 1, :dout]                            # f32  (1, dout), static lane-aligned slice
        z = jnp.dot(h, w, preferred_element_type=jnp.float32) + b
        if i < n_layers - 1:
            # Cast right after the ReLU: keeps the streamed intermediate bf16.
            h = jnp.maximum(z, 0.0).astype(jnp.bfloat16)
        else:
            # Max-shifted softmax over the padded lane width; padded logits are
            # -1e30 (f32) so exp() underflows to exactly 0 there.
            m = jnp.max(z, axis=-1, keepdims=True)
            e = jnp.exp(z - m)
            denom = jnp.sum(e, axis=-1, keepdims=True)
            out_ref[...] = (e * pl.reciprocal(denom, approx=True)).astype(out_ref.dtype)


def pack_actor_params(params, input_dims, n_actions):
    """Pack per-layer (W [in, out], b [out]) into dense bf16 weight buffers (one per
    lane width) plus one (8, max_width) f32 bias tile.  Call once; reuse every step."""
    n_layers = len(params)
    out_pad = _round_up(max(n_actions, LANE), LANE)

    specs = []                                   # (din, din_alloc, dout, dout_alloc)
    for i, (w, b) in enumerate(params):
        din, dout = w.shape
        din_alloc = _round_up(din, 16)           # 16-aligned row offsets (bf16 sublane packing)
        dout_alloc = out_pad if i == n_layers - 1 else _round_up(dout, LANE)
        specs.append((din, din_alloc, dout, dout_alloc))

    # Activation width after layer i-1 must equal layer i's fan-in (true for 128-aligned hiddens).
    for i in range(1, n_layers):
        assert specs[i][0] == specs[i - 1][3], "hidden widths must be 128-aligned"

    widths = sorted({s[3] for s in specs})       # e.g. [128, 256, 512]
    rows = {wd: 0 for wd in widths}
    layout = []                                  # per layer: (buf_idx, row_off, din, dout_alloc)
    for (din, din_alloc, dout, dout_alloc) in specs:
        layout.append((widths.index(dout_alloc), rows[dout_alloc], din, dout_alloc))
        rows[dout_alloc] += din_alloc

    w_bufs = [jnp.zeros((max(rows[wd], 16), wd), jnp.float32) for wd in widths]
    b_rows = _round_up(n_layers, 8)
    b_pack = jnp.zeros((b_rows, max(widths)), jnp.float32)
    for i, ((w, b), (buf, off, din, _)) in enumerate(zip(params, layout)):
        dout = w.shape[1]
        w_bufs[buf] = w_bufs[buf].at[off:off + din, :dout].set(w)
        b_pack = b_pack.at[i, :dout].set(b.reshape(-1))
    # Mask the padded logits of the last layer so softmax assigns them 0 probability.
    b_pack = b_pack.at[n_layers - 1, n_actions:out_pad].set(NEG)

    packed = tuple(wb.astype(jnp.bfloat16) for wb in w_bufs) + (b_pack,)
    meta = dict(layers=tuple(layout), out_pad=out_pad, n_bufs=len(widths),
                input_dims=input_dims, n_actions=n_actions)
    return packed, meta


def actor_forward(state, packed, meta, *, tm=None):
    """state: [B, input_dims] f32 -> [B, n_actions] f32 action distribution."""
    B, F = state.shape
    assert F == meta["input_dims"]
    out_pad, n_actions, n_w = meta["out_pad"], meta["n_actions"], meta["n_bufs"]

    if tm is None:
        tm = _pick_tm(B)
    B_pad = _round_up(B, tm)
    # Batch-only zero pad, and only when actually needed (no feature padding, no zeros+set).
    x = state if B_pad == B else jnp.pad(state, ((0, B_pad - B), (0, 0)))

    kernel = functools.partial(actor_mlp_kernel, layers=meta["layers"], n_w=n_w)
    in_specs = [pl.BlockSpec((tm, F), lambda i: (i, 0))]          # activations stream per tile
    in_specs += [pl.BlockSpec(a.shape, lambda i: (0, 0)) for a in packed]  # weights/biases VMEM-resident

    out = pl.pallas_call(
        kernel,
        out_shape=jax.ShapeDtypeStruct((B_pad, out_pad), jnp.float32),
        grid=(B_pad // tm,),
        in_specs=in_specs,
        out_specs=pl.BlockSpec((tm, out_pad), lambda i: (i, 0)),  # lane-dense 128-wide store
        compiler_params=pltpu.CompilerParams(
            dimension_semantics=("parallel",),                    # megacore / v7x 2-TC sharding
            vmem_limit_bytes=32 * 1024 * 1024,
        ),
    )(x, *packed)
    return out[:B, :n_actions]


def init_params(key, input_dims, n_actions):
    """PyTorch nn.Linear default init: U(-1/sqrt(fan_in), 1/sqrt(fan_in))."""
    dims = (input_dims,) + HIDDENS + (n_actions,)
    params = []
    for i in range(len(dims) - 1):
        fan_in, fan_out = dims[i], dims[i + 1]
        key, kw, kb = jax.random.split(key, 3)
        bound = 1.0 / math.sqrt(fan_in)
        w = jax.random.uniform(kw, (fan_in, fan_out), jnp.float32, -bound, bound)
        b = jax.random.uniform(kb, (fan_out,), jnp.float32, -bound, bound)
        params.append((w, b))
    return params


def reference_forward_f32(state, params):
    h = state
    for i, (w, b) in enumerate(params):
        h = h @ w + b[None, :]
        if i < len(params) - 1:
            h = jnp.maximum(h, 0.0)
    return jax.nn.softmax(h, axis=-1)


def reference_forward_bf16(state, params):
    """Reference mimicking the kernel's precision (bf16 operands, f32 accumulation)."""
    h = state
    for i, (w, b) in enumerate(params):
        z = jnp.dot(h.astype(jnp.bfloat16), w.astype(jnp.bfloat16),
                    preferred_element_type=jnp.float32) + b[None, :]
        h = jnp.maximum(z, 0.0) if i < len(params) - 1 else z
    return jax.nn.softmax(h, axis=-1)


if __name__ == "__main__":
    key = jax.random.PRNGKey(0)
    B, input_dims, n_actions = 8, 16, 8

    kp, kx, kx2 = jax.random.split(key, 3)
    params = init_params(kp, input_dims, n_actions)
    state = jax.random.normal(kx, (B, input_dims), jnp.float32)

    # Pack once (weights frozen for inference), then run the kernel.
    packed, meta = pack_actor_params(params, input_dims, n_actions)

    out = actor_forward(state, packed, meta)
    jax.block_until_ready(out)
    assert out.shape == (B, n_actions)

    ref_bf16 = reference_forward_bf16(state, params)
    ref_f32 = reference_forward_f32(state, params)
    # Precision-matched reference (bf16 matmul operands, f32 accumulation, approx recip).
    assert jnp.allclose(out, ref_bf16, atol=5e-3, rtol=5e-3)
    # Loose semantic check against the pure-f32 PyTorch-equivalent forward.
    assert jnp.allclose(out, ref_f32, atol=2e-2, rtol=2e-2)
    # Rows are valid probability distributions (approx reciprocal -> loosened tolerance).
    assert jnp.allclose(jnp.sum(out, axis=-1), 1.0, atol=5e-3)

    # Multi-tile path: grid > 1 plus a partial final tile (batch-only zero padding).
    B2 = 300
    state2 = jax.random.normal(kx2, (B2, input_dims), jnp.float32)
    out2 = actor_forward(state2, packed, meta)
    jax.block_until_ready(out2)
    assert out2.shape == (B2, n_actions)
    ref2 = reference_forward_bf16(state2, params)
    assert jnp.allclose(out2, ref2, atol=5e-3, rtol=5e-3)
    assert jnp.allclose(jnp.sum(out2, axis=-1), 1.0, atol=5e-3)

    print("KERNEL_OK")
</pallas_src>

<mosaic_0001>
module attributes {stable_mosaic.version = 11 : i64} {
  func.func @actor_mlp_kernel(%arg0: i32, %arg1: memref<8x16xf32, #tpu.memory_space<vmem>>, %arg2: memref<400x128xbf16, #tpu.memory_space<vmem>>, %arg3: memref<640x256xbf16, #tpu.memory_space<vmem>>, %arg4: memref<256x512xbf16, #tpu.memory_space<vmem>>, %arg5: memref<8x512xf32, #tpu.memory_space<vmem>>, %arg6: memref<8x128xf32, #tpu.memory_space<vmem>>) attributes {dimension_semantics = [#tpu.dimension_semantics<parallel>], iteration_bounds = array<i64: 1>, scalar_prefetch = 0 : i64, scratch_operands = 0 : i64, tpu.core_type = #tpu.core_type<tc>, window_params = [{transform_indices = @transform_0, window_bounds = array<i64: 8, 16>}, {pipeline_mode = #tpu.pipeline_mode<synchronous>, transform_indices = @transform_1, window_bounds = array<i64: 400, 128>}, {pipeline_mode = #tpu.pipeline_mode<synchronous>, transform_indices = @transform_2, window_bounds = array<i64: 640, 256>}, {pipeline_mode = #tpu.pipeline_mode<synchronous>, transform_indices = @transform_3, window_bounds = array<i64: 256, 512>}, {pipeline_mode = #tpu.pipeline_mode<synchronous>, transform_indices = @transform_4, window_bounds = array<i64: 8, 512>}, {transform_indices = @transform_5, window_bounds = array<i64: 8, 128>}]} {
    %c0 = arith.constant 0 : index
    %c0_0 = arith.constant 0 : index
    %0 = vector.load %arg1[%c0, %c0_0] : memref<8x16xf32, #tpu.memory_space<vmem>>, vector<8x16xf32>
    %1 = arith.truncf %0 : vector<8x16xf32> to vector<8x16xbf16>
    %c0_1 = arith.constant 0 : index
    %c0_2 = arith.constant 0 : index
    %2 = vector.load %arg2[%c0_1, %c0_2] : memref<400x128xbf16, #tpu.memory_space<vmem>>, vector<16x128xbf16>
    %c0_3 = arith.constant 0 : index
    %c0_4 = arith.constant 0 : index
    %3 = vector.load %arg5[%c0_3, %c0_4] : memref<8x512xf32, #tpu.memory_space<vmem>>, vector<1x128xf32>
    %cst = arith.constant dense<0.000000e+00> : vector<8x128xf32>
    %4 = tpu.matmul %1, %2, %cst {dimension_numbers = #tpu.dot_dimension_numbers<[1], [0], [0], [1], [0, 0, 1, 1], [], []>} : vector<8x16xbf16>, vector<16x128xbf16>, vector<8x128xf32> -> vector<8x128xf32>
    %5 = vector.broadcast %3 : vector<1x128xf32> to vector<8x128xf32>
    %6 = arith.addf %4, %5 : vector<8x128xf32>
    %cst_5 = arith.constant 0.000000e+00 : f32
    %7 = vector.broadcast %cst_5 : f32 to vector<8x128xf32>
    %8 = arith.maximumf %6, %7 : vector<8x128xf32>
    %9 = arith.truncf %8 : vector<8x128xf32> to vector<8x128xbf16>
    %c0_6 = arith.constant 0 : index
    %c0_7 = arith.constant 0 : index
    %10 = vector.load %arg3[%c0_6, %c0_7] : memref<640x256xbf16, #tpu.memory_space<vmem>>, vector<128x256xbf16>
    %c1 = arith.constant 1 : index
    %c0_8 = arith.constant 0 : index
    %11 = vector.load %arg5[%c1, %c0_8] : memref<8x512xf32, #tpu.memory_space<vmem>>, vector<1x256xf32>
    %cst_9 = arith.constant dense<0.000000e+00> : vector<8x256xf32>
    %12 = tpu.matmul %9, %10, %cst_9 {dimension_numbers = #tpu.dot_dimension_numbers<[1], [0], [0], [1], [0, 0, 1, 1], [], []>} : vector<8x128xbf16>, vector<128x256xbf16>, vector<8x256xf32> -> vector<8x256xf32>
    %13 = vector.broadcast %11 : vector<1x256xf32> to vector<8x256xf32>
    %14 = arith.addf %12, %13 : vector<8x256xf32>
    %cst_10 = arith.constant 0.000000e+00 : f32
    %15 = vector.broadcast %cst_10 : f32 to vector<8x256xf32>
    %16 = arith.maximumf %14, %15 : vector<8x256xf32>
    %17 = arith.truncf %16 : vector<8x256xf32> to vector<8x256xbf16>
    %c0_11 = arith.constant 0 : index
    %c0_12 = arith.constant 0 : index
    %18 = vector.load %arg4[%c0_11, %c0_12] : memref<256x512xbf16, #tpu.memory_space<vmem>>, vector<256x512xbf16>
    %c2 = arith.constant 2 : index
    %c0_13 = arith.constant 0 : index
    %19 = vector.load %arg5[%c2, %c0_13] : memref<8x512xf32, #tpu.memory_space<vmem>>, vector<1x512xf32>
    %cst_14 = arith.constant dense<0.000000e+00> : vector<8x512xf32>
    %20 = tpu.matmul %17, %18, %cst_14 {dimension_numbers = #tpu.dot_dimension_numbers<[1], [0], [0], [1], [0, 0, 1, 1], [], []>} : vector<8x256xbf16>, vector<256x512xbf16>, vector<8x512xf32> -> vector<8x512xf32>
    %21 = vector.broadcast %19 : vector<1x512xf32> to vector<8x512xf32>
    %22 = arith.addf %20, %21 : vector<8x512xf32>
    %cst_15 = arith.constant 0.000000e+00 : f32
    %23 = vector.broadcast %cst_15 : f32 to vector<8x512xf32>
    %24 = arith.maximumf %22, %23 : vector<8x512xf32>
    %25 = arith.truncf %24 : vector<8x512xf32> to vector<8x512xbf16>
    %c128 = arith.constant 128 : index
    %c0_16 = arith.constant 0 : index
    %26 = vector.load %arg3[%c128, %c0_16] : memref<640x256xbf16, #tpu.memory_space<vmem>>, vector<512x256xbf16>
    %c3 = arith.constant 3 : index
    %c0_17 = arith.constant 0 : index
    %27 = vector.load %arg5[%c3, %c0_17] : memref<8x512xf32, #tpu.memory_space<vmem>>, vector<1x256xf32>
    %cst_18 = arith.constant dense<0.000000e+00> : vector<8x256xf32>
    %28 = tpu.matmul %25, %26, %cst_18 {dimension_numbers = #tpu.dot_dimension_numbers<[1], [0], [0], [1], [0, 0, 1, 1], [], []>} : vector<8x512xbf16>, vector<512x256xbf16>, vector<8x256xf32> -> vector<8x256xf32>
    %29 = vector.broadcast %27 : vector<1x256xf32> to vector<8x256xf32>
    %30 = arith.addf %28, %29 : vector<8x256xf32>
    %cst_19 = arith.constant 0.000000e+00 : f32
    %31 = vector.broadcast %cst_19 : f32 to vector<8x256xf32>
    %32 = arith.maximumf %30, %31 : vector<8x256xf32>
    %33 = arith.truncf %32 : vector<8x256xf32> to vector<8x256xbf16>
    %c16 = arith.constant 16 : index
    %c0_20 = arith.constant 0 : index
    %34 = vector.load %arg2[%c16, %c0_20] : memref<400x128xbf16, #tpu.memory_space<vmem>>, vector<256x128xbf16>
    %c4 = arith.constant 4 : index
    %c0_21 = arith.constant 0 : index
    %35 = vector.load %arg5[%c4, %c0_21] : memref<8x512xf32, #tpu.memory_space<vmem>>, vector<1x128xf32>
    %cst_22 = arith.constant dense<0.000000e+00> : vector<8x128xf32>
    %36 = tpu.matmul %33, %34, %cst_22 {dimension_numbers = #tpu.dot_dimension_numbers<[1], [0], [0], [1], [0, 0, 1, 1], [], []>} : vector<8x256xbf16>, vector<256x128xbf16>, vector<8x128xf32> -> vector<8x128xf32>
    %37 = vector.broadcast %35 : vector<1x128xf32> to vector<8x128xf32>
    %38 = arith.addf %36, %37 : vector<8x128xf32>
    %cst_23 = arith.constant 0.000000e+00 : f32
    %39 = vector.broadcast %cst_23 : f32 to vector<8x128xf32>
    %40 = arith.maximumf %38, %39 : vector<8x128xf32>
    %41 = arith.truncf %40 : vector<8x128xf32> to vector<8x128xbf16>
    %c272 = arith.constant 272 : index
    %c0_24 = arith.constant 0 : index
    %42 = vector.load %arg2[%c272, %c0_24] : memref<400x128xbf16, #tpu.memory_space<vmem>>, vector<128x128xbf16>
    %c5 = arith.constant 5 : index
    %c0_25 = arith.constant 0 : index
    %43 = vector.load %arg5[%c5, %c0_25] : memref<8x512xf32, #tpu.memory_space<vmem>>, vector<1x128xf32>
    %cst_26 = arith.constant dense<0.000000e+00> : vector<8x128xf32>
    %44 = tpu.matmul %41, %42, %cst_26 {dimension_numbers = #tpu.dot_dimension_numbers<[1], [0], [0], [1], [0, 0, 1, 1], [], []>} : vector<8x128xbf16>, vector<128x128xbf16>, vector<8x128xf32> -> vector<8x128xf32>
    %45 = vector.broadcast %43 : vector<1x128xf32> to vector<8x128xf32>
    %46 = arith.addf %44, %45 : vector<8x128xf32>
    %cst_27 = arith.constant dense<0xFF800000> : vector<8xf32>
    %47 = vector.multi_reduction <maximumf>, %46, %cst_27 [1] : vector<8x128xf32> to vector<8xf32>
    %48 = vector.shape_cast %47 : vector<8xf32> to vector<8x1xf32>
    %49 = vector.broadcast %48 : vector<8x1xf32> to vector<8x128xf32>
    %50 = arith.subf %46, %49 : vector<8x128xf32>
    %51 = math.exp %50 : vector<8x128xf32>
    %cst_28 = arith.constant dense<0.000000e+00> : vector<8xf32>
    %52 = vector.multi_reduction <add>, %51, %cst_28 [1] : vector<8x128xf32> to vector<8xf32>
    %53 = vector.shape_cast %52 : vector<8xf32> to vector<8x1xf32>
    %54 = tpu.reciprocal %53 {approx = true} : vector<8x1xf32> -> vector<8x1xf32>
    %55 = vector.broadcast %54 : vector<8x1xf32> to vector<8x128xf32>
    %56 = arith.mulf %51, %55 : vector<8x128xf32>
    %c0_29 = arith.constant 0 : index
    %c0_30 = arith.constant 0 : index
    %57 = vector.load %arg6[%c0_29, %c0_30] : memref<8x128xf32, #tpu.memory_space<vmem>>, vector<8x128xf32>
    tpu.vector_store %arg6[%c0_29, %c0_30], %56 {strides = array<i32>} : memref<8x128xf32, #tpu.memory_space<vmem>>, vector<8x128xf32>,
    return
  }
  func.func @transform_0(%arg0: i32) -> (i32, i32) {
    %c0_i32 = arith.constant 0 : i32
    %c0_i32_0 = arith.constant 0 : i32
    return %arg0, %c0_i32 : i32, i32
  }
  func.func @transform_1(%arg0: i32) -> (i32, i32) {
    %c0_i32 = arith.constant 0 : i32
    %c0_i32_0 = arith.constant 0 : i32
    %c0_i32_1 = arith.constant 0 : i32
    return %c0_i32, %c0_i32_0 : i32, i32
  }
  func.func @transform_2(%arg0: i32) -> (i32, i32) {
    %c0_i32 = arith.constant 0 : i32
    %c0_i32_0 = arith.constant 0 : i32
    %c0_i32_1 = arith.constant 0 : i32
    return %c0_i32, %c0_i32_0 : i32, i32
  }
  func.func @transform_3(%arg0: i32) -> (i32, i32) {
    %c0_i32 = arith.constant 0 : i32
    %c0_i32_0 = arith.constant 0 : i32
    %c0_i32_1 = arith.constant 0 : i32
    return %c0_i32, %c0_i32_0 : i32, i32
  }
  func.func @transform_4(%arg0: i32) -> (i32, i32) {
    %c0_i32 = arith.constant 0 : i32
    %c0_i32_0 = arith.constant 0 : i32
    %c0_i32_1 = arith.constant 0 : i32
    return %c0_i32, %c0_i32_0 : i32, i32
  }
  func.func @transform_5(%arg0: i32) -> (i32, i32) {
    %c0_i32 = arith.constant 0 : i32
    %c0_i32_0 = arith.constant 0 : i32
    return %arg0, %c0_i32 : i32, i32
  }
}

</mosaic_0001>

<bundles_post_ra>
// kernel: tpu_custom_call.1
= control target key start
LH: loop header
LB: loop body
LE: loop exit
PB: predicated region body
PF: predicated region fallthrough
CT: control target
= control target key end

     0   :  { %10 = vsyncpa [#allocation3], 0  ;;  %s2377_s0 = inlined_call_operand.hbm [shape: f32[8,16], index: 0, kind: input, shape index: {}]   ;;  %s2378_s1 = inlined_call_operand.hbm [shape: bf16[400,128], index: 1, kind: input, shape index: {}]   ;;  %s2379_s2 = inlined_call_operand.hbm [shape: bf16[640,256], index: 2, kind: input, shape index: {}]   ;;  %s2380_s3 = inlined_call_operand.hbm [shape: bf16[256,512], index: 3, kind: input, shape index: {}]   ;;  %s2381_s4 = inlined_call_operand.hbm [shape: f32[8,512], index: 4, kind: input, shape index: {}]   ;;  %s2382_s5 = inlined_call_operand.hbm [shape: f32[8,128], index: 5, kind: output, shape index: {}]  }
   0x1   :  { %11 = vsyncpa [#allocation6], 0 }
   0x2   :  { %12 = vsyncpa [#allocation9], 0 }
   0x3   :  { %13 = vsyncpa [#allocation4], 0  ;;  %s2215_s18 = smov [#allocation5]   ;;  %s2075_s22 = scalar_lea.hbm %s2378_s1, 3200 }
   0x4   :  { %s29_s19 = sshll.u32 %s2215_s18, 4  ;;  %p2076_p0 = scmp.ne.s32.totalorder %s2378_s1, %s2075_s22  ;;  %s30_s19 = int_to_ptr.vmem [resolvable:$true] %s29_s19 }
   0x5   :  { %p2079_p1 = scmp.lt.u32.totalorder %s2075_s22, %s2378_s1 }
   0x7   :  { %p2081_p2 = pnand %p2079_p1, %p2076_p0 }
   0x9   :  { %2084 = shalt.err (!%p2081_p2)
}
   0xa   :  { %s2085_s27 = scalar_lea.vmem %s30_s19, 3200  ;;  %p2090_p4 = scmp.lt.s32.totalorder %s30_s19, %s30_s19 }
   0xb   :  { %p2086_p3 = scmp.ne.s32.totalorder %s30_s19, %s2085_s27  ;;  %p2091_p5 = scmp.lt.s32.totalorder %s2085_s27, %s2085_s27 }
   0xd   :  { %p2092_p6 = por %p2091_p5, %p2090_p4 }
   0xf   :  { %p2093_p7 = pnand %p2092_p6, %p2086_p3 }
  0x11   :  { %2096 = shalt.err (!%p2093_p7)
}
  0x12   :  { %s2216_s28 = smov 64   ;;  %s2217_s29 = smov 4  }
  0x13   :  { %35 = dma.hbm_to_vmem [thread:$0]  %s2378_s1, 3200, %s30_s19, [#allocation6], %s2216_s28, %s2216_s28, %s2217_s29  }
  0x14   :  { %s2218_s7 = smov [#allocation8]   ;;  %s2097_s11 = scalar_lea.hbm %s2380_s3, 8192 }
  0x15   :  { %s53_s8 = sshll.u32 %s2218_s7, 4  ;;  %p2098_p8 = scmp.ne.s32.totalorder %s2380_s3, %s2097_s11  ;;  %s54_s8 = int_to_ptr.vmem [resolvable:$true] %s53_s8 }
  0x16   :  { %p2101_p9 = scmp.lt.u32.totalorder %s2097_s11, %s2380_s3 }
  0x18   :  { %p2103_p10 = pnand %p2101_p9, %p2098_p8 }
  0x1a   :  { %2106 = shalt.err (!%p2103_p10)
}
  0x1b   :  { %s2107_s16 = scalar_lea.vmem %s54_s8, 8192  ;;  %p2112_p12 = scmp.lt.s32.totalorder %s54_s8, %s54_s8 }
  0x1c   :  { %p2108_p11 = scmp.ne.s32.totalorder %s54_s8, %s2107_s16  ;;  %p2113_p13 = scmp.lt.s32.totalorder %s2107_s16, %s2107_s16 }
  0x1e   :  { %p2114_p0 = por %p2113_p13, %p2112_p12 }
  0x20   :  { %p2115_p1 = pnand %p2114_p0, %p2108_p11 }
  0x22   :  { %2118 = shalt.err (!%p2115_p1)
}
  0x23   :  { %s2219_s1 = smov 256   ;;  %s2220_s17 = smov 16  }
  0x24   :  { %59 = dma.hbm_to_vmem [thread:$0]  %s2380_s3, 8192, %s54_s8, [#allocation9], %s2219_s1, %s2219_s1, %s2220_s17  }
  0x25   :  { %s2221_s20 = smov [#allocation2]   ;;  %s2222_s22 = smov [#allocation7]  }
  0x26   :  { %s20_s21 = sshll.u32 %s2221_s20, 4  ;;  %s41_s23 = sshll.u32 %s2222_s22, 4  ;;  %s21_s21 = int_to_ptr.vmem [resolvable:$true] %s20_s21  ;;  %s2284_s23 = int_to_ptr.vmem [resolvable:$true] %s41_s23 }
  0x27   :  { %s2119_s26 = scalar_lea.hbm %s2377_s0, 128 }
  0x28   :  { %p2120_p2 = scmp.ne.s32.totalorder %s2377_s0, %s2119_s26  ;;  %p2123_p3 = scmp.lt.u32.totalorder %s2119_s26, %s2377_s0 }
  0x2a   :  { %p2125_p4 = pnand %p2123_p3, %p2120_p2 }
  0x2c   :  { %2128 = shalt.err (!%p2125_p4)
}
  0x2d   :  { %s2129_s3 = scalar_lea.vmem %s21_s21, 128  ;;  %p2134_p6 = scmp.lt.s32.totalorder %s21_s21, %s21_s21 }
  0x2e   :  { %p2130_p5 = scmp.ne.s32.totalorder %s21_s21, %s2129_s3  ;;  %p2135_p7 = scmp.lt.s32.totalorder %s2129_s3, %s2129_s3 }
  0x30   :  { %p2136_p8 = por %p2135_p7, %p2134_p6 }
  0x32   :  { %p2137_p9 = pnand %p2136_p8, %p2130_p5 }
  0x34   :  { %2140 = shalt.err (!%p2137_p9)
}
  0x35   :  { %23 = dma.hbm_to_vmem [thread:$0]  %s2377_s0, 128, %s21_s21, [#allocation3]  }
  0x36   :  { %s2141_s10 = scalar_lea.hbm %s2379_s2, 10240 }
  0x37   :  { %p2142_p10 = scmp.ne.s32.totalorder %s2379_s2, %s2141_s10  ;;  %p2145_p11 = scmp.lt.u32.totalorder %s2141_s10, %s2379_s2 }
  0x39   :  { %p2147_p12 = pnand %p2145_p11, %p2142_p10 }
  0x3b   :  { %2150 = shalt.err (!%p2147_p12)
}
  0x3c   :  { %s2151_s15 = scalar_lea.vmem %s2284_s23, 10240  ;;  %p2156_p0 = scmp.lt.s32.totalorder %s2284_s23, %s2284_s23 }
  0x3d   :  { %p2152_p13 = scmp.ne.s32.totalorder %s2284_s23, %s2151_s15  ;;  %p2157_p1 = scmp.lt.s32.totalorder %s2151_s15, %s2151_s15 }
  0x3f   :  { %p2158_p2 = por %p2157_p1, %p2156_p0 }
  0x41   :  { %p2159_p3 = pnand %p2158_p2, %p2152_p13 }
  0x43   :  { %2162 = shalt.err (!%p2159_p3)
}
  0x44   :  { %s2223_s0 = smov 128   ;;  %s2224_s16 = smov 8  }
  0x45   :  { %47 = dma.hbm_to_vmem [thread:$0]  %s2379_s2, 10240, %s2284_s23, [#allocation6], %s2223_s0, %s2223_s0, %s2224_s16  }
  0x46   :  { %s2225_s18 = smov [#allocation10]   ;;  %s2163_s22 = scalar_lea.hbm %s2381_s4, 512 }
  0x47   :  { %s66_s19 = sshll.u32 %s2225_s18, 4  ;;  %p2164_p4 = scmp.ne.s32.totalorder %s2381_s4, %s2163_s22  ;;  %s67_s19 = int_to_ptr.vmem [resolvable:$true] %s66_s19 }
  0x48   :  { %p2167_p5 = scmp.lt.u32.totalorder %s2163_s22, %s2381_s4 }
  0x4a   :  { %p2169_p6 = pnand %p2167_p5, %p2164_p4 }
  0x4c   :  { %2172 = shalt.err (!%p2169_p6)
}
  0x4d   :  { %s2173_s28 = scalar_lea.vmem %s67_s19, 512  ;;  %p2178_p8 = scmp.lt.s32.totalorder %s67_s19, %s67_s19 }
  0x4e   :  { %p2174_p7 = scmp.ne.s32.totalorder %s67_s19, %s2173_s28  ;;  %p2179_p9 = scmp.lt.s32.totalorder %s2173_s28, %s2173_s28 }
  0x50   :  { %p2180_p10 = por %p2179_p9, %p2178_p8 }
  0x52   :  { %p2181_p11 = pnand %p2180_p10, %p2174_p7 }
  0x54   :  { %2184 = shalt.err (!%p2181_p11)
}
  0x55   :  { %69 = dma.hbm_to_vmem [thread:$0]  %s2381_s4, 512, %s67_s19, [#allocation9]  }
  0x56   :  { %2207 = dma.done.wait [#allocation3], 128  }
  0x57   :  { %2208 = vsyncadd [#allocation3], 4294967168 }
  0x58   :  { %2209 = dma.done.wait [#allocation6], 13440  }
  0x59   :  { %2210 = vsyncadd [#allocation6], 4294953856 }
  0x5a   :  { %2211 = dma.done.wait [#allocation9], 8704  }
  0x5b   :  { %2212 = vsyncadd [#allocation9], 4294958592  ;;  %v2226_v0 = vmov 0.0   ;;  %vm2227_vm0 = vmmov 0   ;;  %v1830_v1 = vld [vmem:[#allocation5] sm:$0xff]   ;;  %v86_v2 = vld [vmem:[#allocation2] sm:$0xff] }
  0x5c   :  { %1783 = vmatprep.subr.bf16.mxu1 %v2226_v0  ;;  %1785 = vmatprep.mubr.msk.bf16.mxu1 %vm2227_vm0, %v2226_v0  ;;  %v87_v3 = vpack.c.bf16 %v86_v2, %v86_v2  ;;  %vm97_vm1 = vcmask 130048   ;;  %v1831_v4 = vld [vmem:[#allocation7] ss:$8 sps:$4 sm:$0xff]   ;;  %v1833_v5 = vld [vmem:[#allocation7 + $0x4] ss:$8 sps:$4 sm:$0xff]   ;;  %v2228_v20 = vmov 0  }
  0x5d   :  { %1784 = vmatpush3.bf16.msra.mxu1 %v1830_v1  ;;  %v1836_v6 = vld [vmem:[#allocation7 + $0x14] ss:$8 sps:$4 sm:$0xff]   ;;  %v1834_v7 = vld [vmem:[#allocation7 + $0x10] ss:$8 sps:$4 sm:$0xff]   ;;  %v1839_v8 = vld [vmem:[#allocation7 + $0x24] ss:$8 sps:$4 sm:$0xff]  }
  0x5e   :  { %252 = vmatprep.subr.bf16.mxu1 %v1833_v5  ;;  %v1837_v9 = vld [vmem:[#allocation7 + $0x20] ss:$8 sps:$4 sm:$0xff]   ;;  %v1842_v10 = vld [vmem:[#allocation7 + $0x34] ss:$8 sps:$4 sm:$0xff]   ;;  %v1840_v11 = vld [vmem:[#allocation7 + $0x30] ss:$8 sps:$4 sm:$0xff]  }
  0x5f   :  { %v1845_v12 = vld [vmem:[#allocation7 + $0x44] ss:$8 sps:$4 sm:$0xff]   ;;  %v1843_v13 = vld [vmem:[#allocation7 + $0x40] ss:$8 sps:$4 sm:$0xff]   ;;  %v1848_v14 = vld [vmem:[#allocation7 + $0x54] ss:$8 sps:$4 sm:$0xff]  }
  0x60   :  { %1786 = vmatmul.mubr.msk.bf16.vlgmr.msra.gmra.mrb[0].mxu1 %vm97_vm1, %v87_v3  ;;  %v1846_v15 = vld [vmem:[#allocation7 + $0x50] ss:$8 sps:$4 sm:$0xff]   ;;  %v1851_v16 = vld [vmem:[#allocation7 + $0x64] ss:$8 sps:$4 sm:$0xff]   ;;  %v1849_v17 = vld [vmem:[#allocation7 + $0x60] ss:$8 sps:$4 sm:$0xff]  }
  0x61   :  { %253 = vmatpush1.bf16.msra.mxu1 %v1831_v4  ;;  %v1854_v18 = vld [vmem:[#allocation7 + $0x74] ss:$8 sps:$4 sm:$0xff]   ;;  %v1852_v19 = vld [vmem:[#allocation7 + $0x70] ss:$8 sps:$4 sm:$0xff]   ;;  %284 = vmatprep.mubr.bf16.mxu1 %v2228_v20  ;;  %v90_v50 = vld [vmem:[#allocation10] ss:$0 sm:$0xff] }
  0x62   :  { %254 = vmatprep.subr.bf16.mxu1 %v1836_v6  ;;  %v1855_v21 = vld [vmem:[#allocation8 + $0x4] ss:$16 sps:$4 sm:$0xff]   ;;  %v1859_v22 = vld [vmem:[#allocation8 + $0xc] ss:$16 sps:$4 sm:$0xff]   ;;  %v1860_v23 = vld [vmem:[#allocation8] ss:$16 sps:$4 sm:$0xff]  }
  0x63   :  { %v1861_v24 = vld [vmem:[#allocation8 + $0x24] ss:$16 sps:$4 sm:$0xff]   ;;  %704 = vmatprep.subr.bf16.mxu0 %v1855_v21  ;;  %v1866_v25 = vld [vmem:[#allocation8 + $0x20] ss:$16 sps:$4 sm:$0xff]   ;;  %v1857_v57 = vld [vmem:[#allocation8 + $0x8] ss:$16 sps:$4 sm:$0xff]  }
  0x64   :  { %705 = vmatpush1.bf16.msra.mxu0 %v1860_v23  ;;  %v1867_v26 = vld [vmem:[#allocation8 + $0x44] ss:$16 sps:$4 sm:$0xff]   ;;  %v1872_v27 = vld [vmem:[#allocation8 + $0x40] ss:$16 sps:$4 sm:$0xff]   ;;  %v1865_v59 = vld [vmem:[#allocation8 + $0x2c] ss:$16 sps:$4 sm:$0xff]  }
  0x65   :  { %255 = vmatpush1.bf16.msra.mxu1 %v1834_v7  ;;  %706 = vmatprep.subr.bf16.mxu0 %v1861_v24  ;;  %v1873_v28 = vld [vmem:[#allocation8 + $0x64] ss:$16 sps:$4 sm:$0xff]   ;;  %v1878_v29 = vld [vmem:[#allocation8 + $0x60] ss:$16 sps:$4 sm:$0xff]   ;;  %v1863_v60 = vld [vmem:[#allocation8 + $0x28] ss:$16 sps:$4 sm:$0xff]  }
  0x66   :  { %256 = vmatprep.subr.bf16.mxu1 %v1839_v8  ;;  %v1879_v30 = vld [vmem:[#allocation8 + $0x84] ss:$16 sps:$4 sm:$0xff]   ;;  %v1884_v31 = vld [vmem:[#allocation8 + $0x80] ss:$16 sps:$4 sm:$0xff]   ;;  %v1871_v61 = vld [vmem:[#allocation8 + $0x4c] ss:$16 sps:$4 sm:$0xff]  }
  0x67   :  { %v1885_v32 = vld [vmem:[#allocation8 + $0xa4] ss:$16 sps:$4 sm:$0xff]   ;;  %v1890_v33 = vld [vmem:[#allocation8 + $0xa0] ss:$16 sps:$4 sm:$0xff]   ;;  %v1869_v62 = vld [vmem:[#allocation8 + $0x48] ss:$16 sps:$4 sm:$0xff]  }
  0x68   :  { %707 = vmatpush1.bf16.msra.mxu0 %v1866_v25  ;;  %v1891_v34 = vld [vmem:[#allocation8 + $0xc4] ss:$16 sps:$4 sm:$0xff]   ;;  %v1896_v35 = vld [vmem:[#allocation8 + $0xc0] ss:$16 sps:$4 sm:$0xff]   ;;  %v1877_v63 = vld [vmem:[#allocation8 + $0x6c] ss:$16 sps:$4 sm:$0xff]  }
  0x69   :  { %257 = vmatpush1.bf16.msra.mxu1 %v1837_v9  ;;  %708 = vmatprep.subr.bf16.mxu0 %v1867_v26  ;;  %v1897_v36 = vld [vmem:[#allocation8 + $0xe4] ss:$16 sps:$4 sm:$0xff]   ;;  %v1902_v37 = vld [vmem:[#allocation8 + $0xe0] ss:$16 sps:$4 sm:$0xff]   ;;  %v1875_v1 = vld [vmem:[#allocation8 + $0x68] ss:$16 sps:$4 sm:$0xff]  }
  0x6a   :  { %258 = vmatprep.subr.bf16.mxu1 %v1842_v10  ;;  %v1903_v38 = vld [vmem:[#allocation8 + $0x104] ss:$16 sps:$4 sm:$0xff]   ;;  %v1908_v39 = vld [vmem:[#allocation8 + $0x100] ss:$16 sps:$4 sm:$0xff]   ;;  %v1883_v2 = vld [vmem:[#allocation8 + $0x8c] ss:$16 sps:$4 sm:$0xff]  }
  0x6b   :  { %v1909_v40 = vld [vmem:[#allocation8 + $0x124] ss:$16 sps:$4 sm:$0xff]   ;;  %v1914_v41 = vld [vmem:[#allocation8 + $0x120] ss:$16 sps:$4 sm:$0xff]   ;;  %v1881_v3 = vld [vmem:[#allocation8 + $0x88] ss:$16 sps:$4 sm:$0xff]  }
  0x6c   :  { %709 = vmatpush1.bf16.msra.mxu0 %v1872_v27  ;;  %v1915_v42 = vld [vmem:[#allocation8 + $0x144] ss:$16 sps:$4 sm:$0xff]   ;;  %v1920_v43 = vld [vmem:[#allocation8 + $0x140] ss:$16 sps:$4 sm:$0xff]   ;;  %v1889_v4 = vld [vmem:[#allocation8 + $0xac] ss:$16 sps:$4 sm:$0xff]  }
  0x6d   :  { %259 = vmatpush1.bf16.msra.mxu1 %v1840_v11  ;;  %710 = vmatprep.subr.bf16.mxu0 %v1873_v28  ;;  %v1921_v44 = vld [vmem:[#allocation8 + $0x164] ss:$16 sps:$4 sm:$0xff]   ;;  %v1926_v45 = vld [vmem:[#allocation8 + $0x160] ss:$16 sps:$4 sm:$0xff]   ;;  %v1887_v5 = vld [vmem:[#allocation8 + $0xa8] ss:$16 sps:$4 sm:$0xff]  }
  0x6e   :  { %260 = vmatprep.subr.bf16.mxu1 %v1845_v12  ;;  %v1927_v46 = vld [vmem:[#allocation8 + $0x184] ss:$16 sps:$4 sm:$0xff]   ;;  %v1932_v47 = vld [vmem:[#allocation8 + $0x180] ss:$16 sps:$4 sm:$0xff]   ;;  %v1895_v6 = vld [vmem:[#allocation8 + $0xcc] ss:$16 sps:$4 sm:$0xff]  }
  0x6f   :  { %v1933_v48 = vld [vmem:[#allocation8 + $0x1a4] ss:$16 sps:$4 sm:$0xff]   ;;  %v1938_v49 = vld [vmem:[#allocation8 + $0x1a0] ss:$16 sps:$4 sm:$0xff]   ;;  %v1893_v7 = vld [vmem:[#allocation8 + $0xc8] ss:$16 sps:$4 sm:$0xff]  }
  0x70   :  { %711 = vmatpush1.bf16.msra.mxu0 %v1878_v29  ;;  %v1901_v8 = vld [vmem:[#allocation8 + $0xec] ss:$16 sps:$4 sm:$0xff]   ;;  %v1899_v9 = vld [vmem:[#allocation8 + $0xe8] ss:$16 sps:$4 sm:$0xff]   ;;  %v1944_v25 = vld [vmem:[#allocation8 + $0x1c0] ss:$16 sps:$4 sm:$0xff]  }
  0x71   :  { %261 = vmatpush1.bf16.msra.mxu1 %v1843_v13  ;;  %712 = vmatprep.subr.bf16.mxu0 %v1879_v30  ;;  %v1907_v10 = vld [vmem:[#allocation8 + $0x10c] ss:$16 sps:$4 sm:$0xff]   ;;  %v1905_v11 = vld [vmem:[#allocation8 + $0x108] ss:$16 sps:$4 sm:$0xff]   ;;  %v1945_v26 = vld [vmem:[#allocation8 + $0x1e4] ss:$16 sps:$4 sm:$0xff]  }
  0x72   :  { %262 = vmatprep.subr.bf16.mxu1 %v1848_v14  ;;  %v1913_v12 = vld [vmem:[#allocation8 + $0x12c] ss:$16 sps:$4 sm:$0xff]   ;;  %v1911_v13 = vld [vmem:[#allocation8 + $0x128] ss:$16 sps:$4 sm:$0xff]   ;;  %v1950_v29 = vld [vmem:[#allocation8 + $0x1e0] ss:$16 sps:$4 sm:$0xff]  }
  0x73   :  { %v1919_v14 = vld [vmem:[#allocation8 + $0x14c] ss:$16 sps:$4 sm:$0xff]   ;;  %v1935_v21 = vld [vmem:[#allocation8 + $0x1a8] ss:$16 sps:$4 sm:$0xff]   ;;  %s2229_s4 = smov [#allocation11]  }
  0x74   :  { %713 = vmatpush1.bf16.msra.mxu0 %v1884_v31  ;;  %v1937_v20 = vld [vmem:[#allocation8 + $0x1ac] ss:$16 sps:$4 sm:$0xff]   ;;  %v1941_v24 = vld [vmem:[#allocation8 + $0x1c8] ss:$16 sps:$4 sm:$0xff]   ;;  %v162_v31 = vlaneseq  ;;  %s1569_s29 = sshll.u32 %s2229_s4, 4  ;;  %s1570_s29 = int_to_ptr.vmem [resolvable:$true] %s1569_s29 }
  0x75   :  { %263 = vmatpush1.bf16.msra.mxu1 %v1846_v15  ;;  %714 = vmatprep.subr.bf16.mxu0 %v1885_v32  ;;  %v1917_v15 = vld [vmem:[#allocation8 + $0x148] ss:$16 sps:$4 sm:$0xff]   ;;  %v1943_v23 = vld [vmem:[#allocation8 + $0x1cc] ss:$16 sps:$4 sm:$0xff]   ;;  %s2185_s30 = scalar_lea.vmem %s1570_s29, 128  ;;  %p2190_p13 = scmp.lt.s32.totalorder %s1570_s29, %s1570_s29 }
  0x76   :  { %264 = vmatprep.subr.bf16.mxu1 %v1851_v16  ;;  %v1925_v16 = vld [vmem:[#allocation8 + $0x16c] ss:$16 sps:$4 sm:$0xff]   ;;  %v1947_v28 = vld [vmem:[#allocation8 + $0x1e8] ss:$16 sps:$4 sm:$0xff]   ;;  %v2330_v32 = vshrl.u32 %v162_v31, 7  ;;  %p2186_p12 = scmp.ne.s32.totalorder %s1570_s29, %s2185_s30  ;;  %p2191_p0 = scmp.lt.s32.totalorder %s2185_s30, %s2185_s30 }
  0x77   :  { %v1949_v27 = vld [vmem:[#allocation8 + $0x1ec] ss:$16 sps:$4 sm:$0xff]  }
  0x78   :  { %715 = vmatpush1.bf16.msra.mxu0 %v1890_v33  ;;  %v1953_v30 = vld [vmem:[#allocation7 + $0x84] ss:$8 sps:$4 sm:$0xff]   ;;  %v2333_v33 = vsub.s32 0, %v2330_v32  ;;  %p2192_p1 = por %p2191_p0, %p2190_p13 }
  0x79   :  { %265 = vmatpush1.bf16.msra.mxu1 %v1849_v17  ;;  %716 = vmatprep.subr.bf16.mxu0 %v1891_v34  ;;  %v1923_v17 = vld [vmem:[#allocation8 + $0x168] ss:$16 sps:$4 sm:$0xff]  }
  0x7a   :  { %266 = vmatprep.subr.bf16.mxu1 %v1854_v18  ;;  %v1931_v18 = vld [vmem:[#allocation8 + $0x18c] ss:$16 sps:$4 sm:$0xff]   ;;  %v160_v34 = vld [vmem:[#allocation10 + $0x1] ss:$8 sm:$0x3]  ;;  %p2193_p2 = pnand %p2192_p1, %p2186_p12 }
  0x7c   :  { %717 = vmatpush1.bf16.msra.mxu0 %v1896_v35  ;;  %v2336_v35 = vsub.s32 1, %v2330_v32 }
  0x7d   :  { %267 = vmatpush1.bf16.msra.mxu1 %v1852_v19  ;;  %718 = vmatprep.subr.bf16.mxu0 %v1897_v36  ;;  %v1929_v19 = vld [vmem:[#allocation8 + $0x188] ss:$16 sps:$4 sm:$0xff]   ;;  %v165_v36 = vrot.slane %v160_v34, %v2333_v33 }
  0x7e   :  { %745 = vmatprep.subr.bf16.mxu1 %v1859_v22  ;;  %v1939_v22 = vld [vmem:[#allocation8 + $0x1c4] ss:$16 sps:$4 sm:$0xff]  }
  0x80   :  { %719 = vmatpush1.bf16.msra.mxu0 %v1902_v37  ;;  %v169_v37 = vrot.slane %v160_v34, %v2336_v35 }
  0x81   :  { %720 = vmatprep.subr.bf16.mxu0 %v1903_v38 }
  0x84   :  { %721 = vmatpush1.bf16.msra.mxu0 %v1908_v39 }
  0x85   :  { %722 = vmatprep.subr.bf16.mxu0 %v1909_v40 }
  0x88   :  { %723 = vmatpush1.bf16.msra.mxu0 %v1914_v41 }
  0x89   :  { %724 = vmatprep.subr.bf16.mxu0 %v1915_v42 }
  0x8c   :  { %725 = vmatpush1.bf16.msra.mxu0 %v1920_v43 }
  0x8d   :  { %726 = vmatprep.subr.bf16.mxu0 %v1921_v44 }
  0x90   :  { %727 = vmatpush1.bf16.msra.mxu0 %v1926_v45 }
  0x91   :  { %728 = vmatprep.subr.bf16.mxu0 %v1927_v46 }
  0x94   :  { %729 = vmatpush1.bf16.msra.mxu0 %v1932_v47  ;;  %v1951_v47 = vld [vmem:[#allocation7 + $0x80] ss:$8 sps:$4 sm:$0xff]  }
  0x95   :  { %730 = vmatprep.subr.bf16.mxu0 %v1933_v48 }
  0x98   :  { %731 = vmatpush1.bf16.msra.mxu0 %v1938_v49  ;;  %v1956_v49 = vld [vmem:[#allocation7 + $0x94] ss:$8 sps:$4 sm:$0xff]  }
  0x99   :  { %732 = vmatprep.subr.bf16.mxu0 %v1939_v22  ;;  %v2052_v22 = vld [vmem:[#allocation5 + $0x18] sm:$0xff]  }
  0x9c   :  { %733 = vmatpush1.bf16.msra.mxu0 %v1944_v25  ;;  %v2055_v25 = vld [vmem:[#allocation5 + $0x68] sm:$0xff]  }
  0x9d   :  { %734 = vmatprep.subr.bf16.mxu0 %v1945_v26  ;;  %v2056_v26 = vld [vmem:[#allocation5 + $0x28] sm:$0xff]  }
  0xa0   :  { %735 = vmatpush1.bf16.msra.mxu0 %v1950_v29  ;;  %v2340_v29 = vld [vmem:[#allocation10 + $0x2] ss:$8 sm:$0xf] }
  0xa1   :  { %1191 = vmatprep.subr.bf16.mxu0 %v1953_v30  ;;  %v378_v30 = vsub.s32 3, %v2330_v32  ;;  %v367_v31 = vrot.slane %v2340_v29, %v2333_v33  ;;  %v371_v34 = vrot.slane %v2340_v29, %v2336_v35 }
 0x133   :  { %v135_v51 = vpop.f32.mrb[0].mxu1 }
 0x134   :  { %v136_v52 = vadd.f32 %v135_v51, %v90_v50  ;;  %v1787_v53 = vpop.f32.mrb[1].mxu1  ;;  %v1954_v50 = vld [vmem:[#allocation7 + $0x90] ss:$8 sps:$4 sm:$0xff]   ;;  %v1959_v51 = vld [vmem:[#allocation7 + $0xa4] ss:$8 sps:$4 sm:$0xff]  }
 0x135   :  { %v138_v54 = vpop.f32.mrb[2].mxu1  ;;  %v1962_v53 = vld [vmem:[#allocation7 + $0xb4] ss:$8 sps:$4 sm:$0xff]  }
 0x136   :  { %v141_v55 = vmax.f32 %v136_v52, 0.0  ;;  %v1788_v56 = vpop.f32.mrb[3].mxu1  ;;  %v1957_v52 = vld [vmem:[#allocation7 + $0xa0] ss:$8 sps:$4 sm:$0xff]   ;;  %v1960_v54 = vld [vmem:[#allocation7 + $0xb0] ss:$8 sps:$4 sm:$0xff]  }
 0x137   :  { %v1963_v56 = vld [vmem:[#allocation7 + $0xc0] ss:$8 sps:$4 sm:$0xff]  }
 0x138   :  { %v142_v58 = vpack.c.bf16 %v141_v55, %v141_v55  ;;  %v1965_v55 = vld [vmem:[#allocation7 + $0xc4] ss:$8 sps:$4 sm:$0xff]  }
 0x13a   :  { %285 = vmatmul.mubr.bf16.vlgmr.msra.gmra.mrb[4].mxu1 %v142_v58  ;;  %v1966_v58 = vld [vmem:[#allocation7 + $0xd0] ss:$8 sps:$4 sm:$0xff]  }
 0x13b   :  { %746 = vmatpush1.bf16.msra.mxu1 %v1857_v57  ;;  %v1968_v57 = vld [vmem:[#allocation7 + $0xd4] ss:$8 sps:$4 sm:$0xff]  }
 0x13c   :  { %747 = vmatprep.subr.bf16.mxu1 %v1865_v59  ;;  %v1971_v59 = vld [vmem:[#allocation7 + $0xe4] ss:$8 sps:$4 sm:$0xff]  }
 0x13f   :  { %748 = vmatpush1.bf16.msra.mxu1 %v1863_v60  ;;  %v1969_v60 = vld [vmem:[#allocation7 + $0xe0] ss:$8 sps:$4 sm:$0xff]  }
 0x140   :  { %749 = vmatprep.subr.bf16.mxu1 %v1871_v61  ;;  %v1974_v61 = vld [vmem:[#allocation7 + $0xf4] ss:$8 sps:$4 sm:$0xff]  }
 0x143   :  { %750 = vmatpush1.bf16.msra.mxu1 %v1869_v62  ;;  %v1972_v62 = vld [vmem:[#allocation7 + $0xf0] ss:$8 sps:$4 sm:$0xff]  }
 0x144   :  { %751 = vmatprep.subr.bf16.mxu1 %v1877_v63  ;;  %v1977_v63 = vld [vmem:[#allocation7 + $0x104] ss:$8 sps:$4 sm:$0xff]  }
 0x147   :  { %752 = vmatpush1.bf16.msra.mxu1 %v1875_v1  ;;  %v1975_v1 = vld [vmem:[#allocation7 + $0x100] ss:$8 sps:$4 sm:$0xff]  }
 0x148   :  { %753 = vmatprep.subr.bf16.mxu1 %v1883_v2  ;;  %v1980_v2 = vld [vmem:[#allocation7 + $0x114] ss:$8 sps:$4 sm:$0xff]  }
 0x14b   :  { %754 = vmatpush1.bf16.msra.mxu1 %v1881_v3  ;;  %v1978_v3 = vld [vmem:[#allocation7 + $0x110] ss:$8 sps:$4 sm:$0xff]  }
 0x14c   :  { %755 = vmatprep.subr.bf16.mxu1 %v1889_v4  ;;  %v1983_v4 = vld [vmem:[#allocation7 + $0x124] ss:$8 sps:$4 sm:$0xff]  }
 0x14f   :  { %756 = vmatpush1.bf16.msra.mxu1 %v1887_v5  ;;  %v1981_v5 = vld [vmem:[#allocation7 + $0x120] ss:$8 sps:$4 sm:$0xff]  }
 0x150   :  { %757 = vmatprep.subr.bf16.mxu1 %v1895_v6  ;;  %v1986_v6 = vld [vmem:[#allocation7 + $0x134] ss:$8 sps:$4 sm:$0xff]  }
 0x153   :  { %758 = vmatpush1.bf16.msra.mxu1 %v1893_v7  ;;  %v1984_v7 = vld [vmem:[#allocation7 + $0x130] ss:$8 sps:$4 sm:$0xff]  }
 0x154   :  { %759 = vmatprep.subr.bf16.mxu1 %v1901_v8  ;;  %v1989_v8 = vld [vmem:[#allocation7 + $0x144] ss:$8 sps:$4 sm:$0xff]  }
 0x157   :  { %760 = vmatpush1.bf16.msra.mxu1 %v1899_v9  ;;  %v1987_v9 = vld [vmem:[#allocation7 + $0x140] ss:$8 sps:$4 sm:$0xff]  }
 0x158   :  { %761 = vmatprep.subr.bf16.mxu1 %v1907_v10  ;;  %v1992_v10 = vld [vmem:[#allocation7 + $0x154] ss:$8 sps:$4 sm:$0xff]  }
 0x15b   :  { %762 = vmatpush1.bf16.msra.mxu1 %v1905_v11  ;;  %v1990_v11 = vld [vmem:[#allocation7 + $0x150] ss:$8 sps:$4 sm:$0xff]  }
 0x15c   :  { %763 = vmatprep.subr.bf16.mxu1 %v1913_v12  ;;  %v1995_v12 = vld [vmem:[#allocation7 + $0x164] ss:$8 sps:$4 sm:$0xff]  }
 0x15f   :  { %764 = vmatpush1.bf16.msra.mxu1 %v1911_v13  ;;  %v1993_v13 = vld [vmem:[#allocation7 + $0x160] ss:$8 sps:$4 sm:$0xff]  }
 0x160   :  { %765 = vmatprep.subr.bf16.mxu1 %v1919_v14  ;;  %v1998_v14 = vld [vmem:[#allocation7 + $0x174] ss:$8 sps:$4 sm:$0xff]  }
 0x163   :  { %766 = vmatpush1.bf16.msra.mxu1 %v1917_v15  ;;  %v1996_v15 = vld [vmem:[#allocation7 + $0x170] ss:$8 sps:$4 sm:$0xff]  }
 0x164   :  { %767 = vmatprep.subr.bf16.mxu1 %v1925_v16  ;;  %v2001_v16 = vld [vmem:[#allocation7 + $0x184] ss:$8 sps:$4 sm:$0xff]  }
 0x167   :  { %768 = vmatpush1.bf16.msra.mxu1 %v1923_v17  ;;  %v2047_v17 = vld [vmem:[#allocation5 + $0x48] sm:$0xff]  }
 0x168   :  { %769 = vmatprep.subr.bf16.mxu1 %v1931_v18  ;;  %v2048_v18 = vld [vmem:[#allocation5 + $0x8] sm:$0xff]  }
 0x16b   :  { %770 = vmatpush1.bf16.msra.mxu1 %v1929_v19  ;;  %v2049_v19 = vld [vmem:[#allocation5 + $0x50] sm:$0xff]  }
 0x16c   :  { %771 = vmatprep.subr.bf16.mxu1 %v1937_v20  ;;  %v2050_v20 = vld [vmem:[#allocation5 + $0x10] sm:$0xff]  }
 0x16f   :  { %772 = vmatpush1.bf16.msra.mxu1 %v1935_v21  ;;  %v2051_v21 = vld [vmem:[#allocation5 + $0x58] sm:$0xff]  }
 0x170   :  { %773 = vmatprep.subr.bf16.mxu1 %v1943_v23  ;;  %v2053_v23 = vld [vmem:[#allocation5 + $0x60] sm:$0xff]  }
 0x173   :  { %774 = vmatpush1.bf16.msra.mxu1 %v1941_v24  ;;  %v2054_v24 = vld [vmem:[#allocation5 + $0x20] sm:$0xff]  }
 0x174   :  { %775 = vmatprep.subr.bf16.mxu1 %v1949_v27  ;;  %v2057_v27 = vld [vmem:[#allocation5 + $0x70] sm:$0xff]  }
 0x177   :  { %776 = vmatpush1.bf16.msra.mxu1 %v1947_v28  ;;  %v2058_v28 = vld [vmem:[#allocation5 + $0x30] sm:$0xff]  }
 0x178   :  { %1752 = vmatprep.subr.bf16.mxu1 %v2047_v17  ;;  %v2040_v17 = vld [vmem:[#allocation7 + $0x254] ss:$8 sps:$4 sm:$0xff]  }
 0x20d   :  { %v286_v38 = vpop.f32.mrb[4].mxu1 }
 0x20e   :  { %v287_v39 = vadd.f32 %v286_v38, %v165_v36  ;;  %v288_v40 = vpop.f32.mrb[5].mxu1  ;;  %v379_v36 = vrot.slane %v2340_v29, %v378_v30  ;;  %v859_v30 = vld [vmem:[#allocation10 + $0x3] ss:$8 sm:$0x3] }
 0x20f   :  { %v289_v41 = vadd.f32 %v288_v40, %v169_v37  ;;  %v290_v42 = vpop.f32.mrb[6].mxu1 }
 0x210   :  { %v293_v43 = vmax.f32 %v287_v39, 0.0  ;;  %v291_v44 = vpop.f32.mrb[7].mxu1 }
 0x211   :  { %v294_v45 = vmax.f32 %v289_v41, 0.0 }
 0x212   :  { %v295_v48 = vpack.c.bf16 %v293_v43, %v293_v43 }
 0x213   :  { %v296_v46 = vpack.c.bf16 %v294_v45, %v294_v45 }
 0x215   :  { %736 = vmatprep.mubr.bf16.mxu0 %v296_v46  ;;  %777 = vmatprep.mubr.bf16.mxu1 %v296_v46 }
 0x216   :  { %737 = vmatmul.mubr.bf16.vlgmr.msra.gmra.mrb[0].mxu0 %v295_v48  ;;  %778 = vmatmul.mubr.bf16.vlgmr.msra.gmra.mrb[8].mxu1 %v295_v48 }
 0x217   :  { %1192 = vmatpush1.bf16.msra.mxu0 %v1951_v47  ;;  %1753 = vmatpush3.bf16.msra.mxu1 %v2048_v18  ;;  %v2038_v18 = vld [vmem:[#allocation7 + $0x250] ss:$8 sps:$4 sm:$0xff]  }
 0x218   :  { %1193 = vmatprep.subr.bf16.mxu0 %v1956_v49  ;;  %1754 = vmatprep.subr.bf16.mxu1 %v2049_v19 }
 0x21b   :  { %1194 = vmatpush1.bf16.msra.mxu0 %v1954_v50  ;;  %1755 = vmatpush3.bf16.msra.mxu1 %v2050_v20  ;;  %v2043_v20 = vld [vmem:[#allocation7 + $0x264] ss:$8 sps:$4 sm:$0xff]  }
 0x21c   :  { %1195 = vmatprep.subr.bf16.mxu0 %v1959_v51  ;;  %1756 = vmatprep.subr.bf16.mxu1 %v2051_v21  ;;  %v2041_v21 = vld [vmem:[#allocation7 + $0x260] ss:$8 sps:$4 sm:$0xff]  }
 0x21f   :  { %1196 = vmatpush1.bf16.msra.mxu0 %v1957_v52  ;;  %1757 = vmatpush3.bf16.msra.mxu1 %v2052_v22  ;;  %v1999_v52 = vld [vmem:[#allocation7 + $0x180] ss:$8 sps:$4 sm:$0xff]  }
 0x220   :  { %1197 = vmatprep.subr.bf16.mxu0 %v1962_v53  ;;  %1758 = vmatprep.subr.bf16.mxu1 %v2053_v23  ;;  %v2046_v23 = vld [vmem:[#allocation7 + $0x274] ss:$8 sps:$4 sm:$0xff]  }
 0x223   :  { %1198 = vmatpush1.bf16.msra.mxu0 %v1960_v54  ;;  %1759 = vmatpush3.bf16.msra.mxu1 %v2054_v24  ;;  %v2004_v54 = vld [vmem:[#allocation7 + $0x194] ss:$8 sps:$4 sm:$0xff]   ;;  %v2044_v24 = vld [vmem:[#allocation7 + $0x270] ss:$8 sps:$4 sm:$0xff]  }
 0x224   :  { %1199 = vmatprep.subr.bf16.mxu0 %v1965_v55  ;;  %1760 = vmatprep.subr.bf16.mxu1 %v2055_v25 }
 0x227   :  { %1200 = vmatpush1.bf16.msra.mxu0 %v1963_v56  ;;  %1761 = vmatpush3.bf16.msra.mxu1 %v2056_v26  ;;  %v2002_v56 = vld [vmem:[#allocation7 + $0x190] ss:$8 sps:$4 sm:$0xff]  }
 0x228   :  { %1201 = vmatprep.subr.bf16.mxu0 %v1968_v57  ;;  %1762 = vmatprep.subr.bf16.mxu1 %v2057_v27  ;;  %v2007_v57 = vld [vmem:[#allocation7 + $0x1a4] ss:$8 sps:$4 sm:$0xff]   ;;  %v2059_v26 = vld [vmem:[#allocation5 + $0x78] sm:$0xff]  }
 0x229   :  { %v2060_v27 = vld [vmem:[#allocation5 + $0x38] sm:$0xff]  }
 0x22b   :  { %1202 = vmatpush1.bf16.msra.mxu0 %v1966_v58  ;;  %1763 = vmatpush3.bf16.msra.mxu1 %v2058_v28  ;;  %v2005_v58 = vld [vmem:[#allocation7 + $0x1a0] ss:$8 sps:$4 sm:$0xff]   ;;  %v2061_v28 = vld [vmem:[#allocation5 + $0x80] sm:$0xff]  }
 0x22c   :  { %1203 = vmatprep.subr.bf16.mxu0 %v1971_v59  ;;  %v2010_v59 = vld [vmem:[#allocation7 + $0x1b4] ss:$8 sps:$4 sm:$0xff]   ;;  %1764 = vmatprep.subr.bf16.mxu1 %v2059_v26 }
 0x22f   :  { %1204 = vmatpush1.bf16.msra.mxu0 %v1969_v60  ;;  %v2008_v60 = vld [vmem:[#allocation7 + $0x1b0] ss:$8 sps:$4 sm:$0xff]   ;;  %1765 = vmatpush3.bf16.msra.mxu1 %v2060_v27 }
 0x230   :  { %1205 = vmatprep.subr.bf16.mxu0 %v1974_v61  ;;  %v2013_v61 = vld [vmem:[#allocation7 + $0x1c4] ss:$8 sps:$4 sm:$0xff]   ;;  %1766 = vmatprep.subr.bf16.mxu1 %v2061_v28 }
 0x233   :  { %1206 = vmatpush1.bf16.msra.mxu0 %v1972_v62  ;;  %v2011_v62 = vld [vmem:[#allocation7 + $0x1c0] ss:$8 sps:$4 sm:$0xff]  }
 0x234   :  { %1207 = vmatprep.subr.bf16.mxu0 %v1977_v63  ;;  %v2016_v63 = vld [vmem:[#allocation7 + $0x1d4] ss:$8 sps:$4 sm:$0xff]  }
 0x237   :  { %1208 = vmatpush1.bf16.msra.mxu0 %v1975_v1  ;;  %v2014_v1 = vld [vmem:[#allocation7 + $0x1d0] ss:$8 sps:$4 sm:$0xff]  }
 0x238   :  { %1209 = vmatprep.subr.bf16.mxu0 %v1980_v2  ;;  %v2019_v2 = vld [vmem:[#allocation7 + $0x1e4] ss:$8 sps:$4 sm:$0xff]  }
 0x23b   :  { %1210 = vmatpush1.bf16.msra.mxu0 %v1978_v3  ;;  %v2017_v3 = vld [vmem:[#allocation7 + $0x1e0] ss:$8 sps:$4 sm:$0xff]  }
 0x23c   :  { %1211 = vmatprep.subr.bf16.mxu0 %v1983_v4  ;;  %v2022_v4 = vld [vmem:[#allocation7 + $0x1f4] ss:$8 sps:$4 sm:$0xff]  }
 0x23f   :  { %1212 = vmatpush1.bf16.msra.mxu0 %v1981_v5  ;;  %v2020_v5 = vld [vmem:[#allocation7 + $0x1f0] ss:$8 sps:$4 sm:$0xff]  }
 0x240   :  { %1213 = vmatprep.subr.bf16.mxu0 %v1986_v6  ;;  %v2025_v6 = vld [vmem:[#allocation7 + $0x204] ss:$8 sps:$4 sm:$0xff]  }
 0x243   :  { %1214 = vmatpush1.bf16.msra.mxu0 %v1984_v7  ;;  %v2023_v7 = vld [vmem:[#allocation7 + $0x200] ss:$8 sps:$4 sm:$0xff]  }
 0x244   :  { %1215 = vmatprep.subr.bf16.mxu0 %v1989_v8  ;;  %v2028_v8 = vld [vmem:[#allocation7 + $0x214] ss:$8 sps:$4 sm:$0xff]  }
 0x247   :  { %1216 = vmatpush1.bf16.msra.mxu0 %v1987_v9  ;;  %v2026_v9 = vld [vmem:[#allocation7 + $0x210] ss:$8 sps:$4 sm:$0xff]  }
 0x248   :  { %1217 = vmatprep.subr.bf16.mxu0 %v1992_v10  ;;  %v2031_v10 = vld [vmem:[#allocation7 + $0x224] ss:$8 sps:$4 sm:$0xff]  }
 0x24b   :  { %1218 = vmatpush1.bf16.msra.mxu0 %v1990_v11  ;;  %v2029_v11 = vld [vmem:[#allocation7 + $0x220] ss:$8 sps:$4 sm:$0xff]  }
 0x24c   :  { %1219 = vmatprep.subr.bf16.mxu0 %v1995_v12  ;;  %v2034_v12 = vld [vmem:[#allocation7 + $0x234] ss:$8 sps:$4 sm:$0xff]  }
 0x24f   :  { %1220 = vmatpush1.bf16.msra.mxu0 %v1993_v13  ;;  %v2032_v13 = vld [vmem:[#allocation7 + $0x230] ss:$8 sps:$4 sm:$0xff]  }
 0x250   :  { %1221 = vmatprep.subr.bf16.mxu0 %v1998_v14  ;;  %v2037_v14 = vld [vmem:[#allocation7 + $0x244] ss:$8 sps:$4 sm:$0xff]  }
 0x253   :  { %1222 = vmatpush1.bf16.msra.mxu0 %v1996_v15  ;;  %v2035_v15 = vld [vmem:[#allocation7 + $0x240] ss:$8 sps:$4 sm:$0xff]  }
 0x254   :  { %1232 = vmatprep.subr.bf16.mxu0 %v2001_v16  ;;  %v374_v16 = vsub.s32 2, %v2330_v32 }
 0x256   :  { %v375_v19 = vrot.slane %v2340_v29, %v374_v16  ;;  %v2062_v29 = vld [vmem:[#allocation5 + $0x40] sm:$0xff]  }
 0x257   :  { %1767 = vmatpush3.bf16.msra.mxu1 %v2062_v29 }
 0x258   :  { %1789 = vmatprep.subr.bf16.mxu1 %v2226_v0 }
 0x2e9   :  { %v738_v37 = vpop.f32.mrb[0].mxu0  ;;  %v2348_v38 = vpop.f32.mrb[8].mxu1 }
 0x2ea   :  { %v739_v39 = vadd.f32 %v738_v37, %v367_v31  ;;  %v740_v40 = vpop.f32.mrb[1].mxu0  ;;  %v781_v41 = vpop.f32.mrb[9].mxu1  ;;  %v780_v22 = vadd.f32 %v2348_v38, %v375_v19  ;;  %v864_v31 = vrot.slane %v859_v30, %v2333_v33  ;;  %v2065_v33 = vld [vmem:[#allocation5 + $0x98] sm:$0xff]  }
 0x2eb   :  { %v741_v42 = vadd.f32 %v740_v40, %v371_v34  ;;  %v782_v43 = vadd.f32 %v781_v41, %v379_v36  ;;  %v742_v44 = vpop.f32.mrb[2].mxu0  ;;  %v783_v45 = vpop.f32.mrb[10].mxu1  ;;  %v868_v34 = vrot.slane %v859_v30, %v2336_v35  ;;  %v2066_v35 = vld [vmem:[#allocation5 + $0xa0] sm:$0xff]  }
 0x2ec   :  { %v786_v46 = vmax.f32 %v739_v39, 0.0  ;;  %v743_v47 = vpop.f32.mrb[3].mxu0  ;;  %v784_v48 = vpop.f32.mrb[11].mxu1  ;;  %v788_v25 = vmax.f32 %v780_v22, 0.0  ;;  %v2063_v45 = vld [vmem:[#allocation5 + $0x88] sm:$0xff]  }
 0x2ed   :  { %v787_v49 = vmax.f32 %v741_v42, 0.0  ;;  %v789_v50 = vmax.f32 %v782_v43, 0.0  ;;  %v2064_v47 = vld [vmem:[#allocation5 + $0x90] sm:$0xff]   ;;  %v2067_v48 = vld [vmem:[#allocation5 + $0xa8] sm:$0xff]  }
 0x2ee   :  { %v790_v53 = vpack.c.bf16 %v786_v46, %v786_v46  ;;  %v792_v32 = vpack.c.bf16 %v788_v25, %v788_v25 }
 0x2ef   :  { %v791_v51 = vpack.c.bf16 %v787_v49, %v787_v49  ;;  %v793_v55 = vpack.c.bf16 %v789_v50, %v789_v50  ;;  %v2068_v49 = vld [vmem:[#allocation5 + $0xb0] sm:$0xff]   ;;  %v2069_v50 = vld [vmem:[#allocation5 + $0xb8] sm:$0xff]  }
 0x2f1   :  { %1223 = vmatprep.mubr.bf16.mxu0 %v791_v51  ;;  %v2070_v51 = vld [vmem:[#allocation5 + $0xc0] sm:$0xff]  }
 0x2f2   :  { %1224 = vmatmul.mubr.bf16.vlgmr.msra.gmra.mrb[4].mxu0 %v790_v53  ;;  %v1309_v53 = vld [vmem:[#allocation10 + $0x4] ss:$0 sm:$0xff] }
 0x2f3   :  { %1233 = vmatpush1.bf16.msra.mxu0 %v1999_v52  ;;  %1264 = vmatprep.mubr.bf16.mxu0 %v793_v55 }
 0x2f4   :  { %1234 = vmatprep.subr.bf16.mxu0 %v2004_v54 }
 0x2f7   :  { %1235 = vmatpush1.bf16.msra.mxu0 %v2002_v56 }
 0x2f8   :  { %1236 = vmatprep.subr.bf16.mxu0 %v2007_v57 }
 0x2fb   :  { %1237 = vmatpush1.bf16.msra.mxu0 %v2005_v58 }
 0x2fc   :  { %1238 = vmatprep.subr.bf16.mxu0 %v2010_v59 }
 0x2ff   :  { %1239 = vmatpush1.bf16.msra.mxu0 %v2008_v60 }
 0x300   :  { %1240 = vmatprep.subr.bf16.mxu0 %v2013_v61  ;;  %v1464_v61 = vld [vmem:[#allocation10 + $0x5] ss:$0 sm:$0xff] }
 0x303   :  { %1241 = vmatpush1.bf16.msra.mxu0 %v2011_v62 }
 0x304   :  { %1242 = vmatprep.subr.bf16.mxu0 %v2016_v63 }
 0x307   :  { %1243 = vmatpush1.bf16.msra.mxu0 %v2014_v1 }
 0x308   :  { %1244 = vmatprep.subr.bf16.mxu0 %v2019_v2 }
 0x30b   :  { %1245 = vmatpush1.bf16.msra.mxu0 %v2017_v3 }
 0x30c   :  { %1246 = vmatprep.subr.bf16.mxu0 %v2022_v4 }
 0x30f   :  { %1247 = vmatpush1.bf16.msra.mxu0 %v2020_v5 }
 0x310   :  { %1248 = vmatprep.subr.bf16.mxu0 %v2025_v6 }
 0x313   :  { %1249 = vmatpush1.bf16.msra.mxu0 %v2023_v7 }
 0x314   :  { %1250 = vmatprep.subr.bf16.mxu0 %v2028_v8 }
 0x317   :  { %1251 = vmatpush1.bf16.msra.mxu0 %v2026_v9 }
 0x318   :  { %1252 = vmatprep.subr.bf16.mxu0 %v2031_v10 }
 0x31b   :  { %1253 = vmatpush1.bf16.msra.mxu0 %v2029_v11 }
 0x31c   :  { %1254 = vmatprep.subr.bf16.mxu0 %v2034_v12 }
 0x31f   :  { %1255 = vmatpush1.bf16.msra.mxu0 %v2032_v13 }
 0x320   :  { %1256 = vmatprep.subr.bf16.mxu0 %v2037_v14 }
 0x323   :  { %1257 = vmatpush1.bf16.msra.mxu0 %v2035_v15 }
 0x324   :  { %1258 = vmatprep.subr.bf16.mxu0 %v2040_v17 }
 0x327   :  { %1259 = vmatpush1.bf16.msra.mxu0 %v2038_v18 }
 0x328   :  { %1260 = vmatprep.subr.bf16.mxu0 %v2043_v20 }
 0x32b   :  { %1261 = vmatpush1.bf16.msra.mxu0 %v2041_v21 }
 0x32c   :  { %1262 = vmatprep.subr.bf16.mxu0 %v2046_v23 }
 0x32f   :  { %1263 = vmatpush1.bf16.msra.mxu0 %v2044_v24 }
 0x332   :  { %1265 = vmatmul.mubr.bf16.vlgmr.msra.gmra.mrb[4].mxu0 %v792_v32 }
 0x405   :  { %v1266_v36 = vpop.f32.mrb[4].mxu0 }
 0x406   :  { %v1809_v37 = vadd.f32 %v1266_v36, %v864_v31  ;;  %v1268_v38 = vpop.f32.mrb[5].mxu0 }
 0x407   :  { %v1810_v39 = vadd.f32 %v1268_v38, %v868_v34  ;;  %v1270_v40 = vpop.f32.mrb[6].mxu0 }
 0x408   :  { %v1273_v41 = vmax.f32 %v1809_v37, 0.0  ;;  %v1271_v42 = vpop.f32.mrb[7].mxu0 }
 0x409   :  { %v1274_v43 = vmax.f32 %v1810_v39, 0.0 }
 0x40a   :  { %v1275_v46 = vpack.c.bf16 %v1273_v41, %v1273_v41 }
 0x40b   :  { %v1276_v44 = vpack.c.bf16 %v1274_v43, %v1274_v43 }
 0x40d   :  { %1438 = vmatprep.mubr.bf16.mxu1 %v1276_v44 }
 0x40e   :  { %1439 = vmatmul.mubr.bf16.vlgmr.msra.gmra.mrb[12].mxu1 %v1275_v46 }
 0x40f   :  { %1790 = vmatpush3.bf16.msra.mxu1 %v2063_v45  ;;  %1805 = vmatprep.mubr.msk.bf16.mxu1 %vm2227_vm0, %v2226_v0 }
 0x410   :  { %1791 = vmatprep.subr.bf16.mxu1 %v2226_v0 }
 0x413   :  { %1792 = vmatpush3.bf16.msra.mxu1 %v2064_v47 }
 0x414   :  { %1793 = vmatprep.subr.bf16.mxu1 %v2226_v0 }
 0x417   :  { %1794 = vmatpush3.bf16.msra.mxu1 %v2065_v33 }
 0x418   :  { %1795 = vmatprep.subr.bf16.mxu1 %v2226_v0 }
 0x41b   :  { %1796 = vmatpush3.bf16.msra.mxu1 %v2066_v35 }
 0x41c   :  { %1797 = vmatprep.subr.bf16.mxu1 %v2226_v0 }
 0x41f   :  { %1798 = vmatpush3.bf16.msra.mxu1 %v2067_v48 }
 0x420   :  { %1799 = vmatprep.subr.bf16.mxu1 %v2226_v0 }
 0x423   :  { %1800 = vmatpush3.bf16.msra.mxu1 %v2068_v49 }
 0x424   :  { %1801 = vmatprep.subr.bf16.mxu1 %v2226_v0 }
 0x427   :  { %1802 = vmatpush3.bf16.msra.mxu1 %v2069_v50 }
 0x428   :  { %1803 = vmatprep.subr.bf16.mxu1 %v2226_v0 }
 0x42b   :  { %1804 = vmatpush3.bf16.msra.mxu1 %v2070_v51 }
 0x4e1   :  { %v1768_v52 = vpop.f32.mrb[12].mxu1 }
 0x4e2   :  { %v1769_v54 = vpop.f32.mrb[13].mxu1 }
 0x4e3   :  { %v1770_v55 = vadd.f32 %v1769_v54, %v1768_v52  ;;  %v1771_v56 = vpop.f32.mrb[14].mxu1 }
 0x4e4   :  { %v1772_v57 = vpop.f32.mrb[15].mxu1 }
 0x4e5   :  { %v1441_v58 = vadd.f32 %v1770_v55, %v1309_v53 }
 0x4e7   :  { %v1446_v59 = vmax.f32 %v1441_v58, 0.0 }
 0x4e9   :  { %v1447_v60 = vpack.c.bf16 %v1446_v59, %v1446_v59 }
 0x4eb   :  { %1806 = vmatmul.mubr.bf16.vlgmr.msra.gmra.mrb[16].mxu1 %v1447_v60 }
 0x5be   :  { %v1547_v62 = vpop.f32.mrb[16].mxu1 }
 0x5bf   :  { %v1548_v63 = vadd.f32 %v1547_v62, %v1464_v61  ;;  %v1807_v1 = vpop.f32.mrb[17].mxu1 }
 0x5c0   :  { %v1550_v2 = vpop.f32.mrb[18].mxu1 }
 0x5c1   :  { %1553 = vmax.xlane.f32.xlu0 %v1548_v63  ;;  %v1808_v3 = vpop.f32.mrb[19].mxu1 }
 0x64e   :  { %v1554_v0 = vpop.xlane.xlu0 %1553 }
 0x64f   :  { %v1555_v4 = vsub.f32 %v1548_v63, %v1554_v0 }
 0x651   :  { %v1556_v5 = vmul.f32 1.442695, %v1555_v4 }
 0x653   :  { %2071 = vpow2.f32 %v1556_v5 }
 0x65d   :  { %v2072_v6 = vpop.eup %2071 }
 0x65e   :  { %1558 = vadd.xlane.f32.xlu0 %v2072_v6 }
 0x6eb   :  { %v1559_v7 = vpop.xlane.xlu0 %1558 }
 0x6ec   :  { %2073 = vrcp.f32 %v1559_v7 }
 0x6f6   :  { %v2074_v8 = vpop.eup %2073 }
 0x6f7   :  { %v1561_v9 = vmul.f32 %v2074_v8, %v2072_v6 }
 0x6f9   :  { %1562 = vst [vmem:[#allocation11] sm:$0xff] %v1561_v9 }
 0x6fa   :  { %2196 = shalt.err (!%p2193_p2)
}
 0x6fb   :  { %s2197_s7 = scalar_lea.hbm %s2382_s5, 128 }
 0x6fc   :  { %p2198_p3 = scmp.ne.s32.totalorder %s2382_s5, %s2197_s7  ;;  %p2201_p4 = scmp.lt.u32.totalorder %s2197_s7, %s2382_s5 }
 0x6fe   :  { %p2203_p5 = pnand %p2201_p4, %p2198_p3 }
 0x700   :  { %2206 = shalt.err (!%p2203_p5)
}
 0x701   :  { %1572 = dma.vmem_to_hbm [thread:$0]  %s1570_s29, 128, %s2382_s5, [#allocation4]  }
 0x702   :  { %2213 = dma.done.wait [#allocation4], 128  }
 0x703   :  { %2214 = vsyncadd [#allocation4], 4294967168 }
 0x704   :  { %1576 = vsyncpa [#allocation3], 1 }
 0x705   :  { %1577 = vsyncpa [#allocation6], 1 }
 0x706   :  { %1578 = vsyncpa [#allocation9], 1 }
 0x707   :  { %1579 = vsyncpa [#allocation4], 1 }

</bundles_post_ra>
